<compile_context>
chip_gen: v6e
topology: v6e:2x2x1
jax: 0.10.0
libtpu: 0.0.40
codegen_flags: <defaults>
</compile_context>

<pallas_src>
import jax
import jax.numpy as jnp
from jax.experimental import pallas as pl
from jax.experimental.pallas import tpu as pltpu


def _swish_kernel(x_ref, o_ref):
    x = x_ref[...].astype(jnp.float32)
    # sigmoid(x) == 0.5 * (1 + tanh(x/2)): a single EUP transcendental/elem.
    sig = 0.5 * (jnp.tanh(0.5 * x) + 1.0)
    o_ref[...] = (x * sig).astype(o_ref.dtype)


def _tpu_vmem_capacity_bytes() -> int:
    try:
        return int(pltpu.get_tpu_info().vmem_capacity_bytes)
    except Exception:
        # Conservative (v7x-sized) fallback; safe on every generation.
        return 64 << 20


def swish(x: jnp.ndarray) -> jnp.ndarray:
    """Elementwise Swish via Pallas. Floating-point input, same shape/dtype out."""
    orig_shape = x.shape
    orig_dtype = x.dtype
    assert jnp.issubdtype(orig_dtype, jnp.floating), "swish kernel supports float dtypes"

    n = int(x.size)
    if n == 0:
        return x

    itemsize = jnp.dtype(orig_dtype).itemsize
    total_bytes = n * itemsize

    # ---- generation-aware sizing -------------------------------------------
    vmem_cap = _tpu_vmem_capacity_bytes()
    if vmem_cap <= 80 << 20:          # v7x-class part (64 MiB VMEM per TC)
        target_block_bytes = 8 << 20
    else:                             # v5e / v6e (128 MiB VMEM)
        target_block_bytes = 4 << 20
    # in + out, double-buffered, plus headroom — computed, not a blanket 48 MiB.
    vmem_limit = int(min(4 * target_block_bytes + (8 << 20), vmem_cap - (4 << 20)))

    compiler_params = pltpu.CompilerParams(
        dimension_semantics=("parallel",),
        vmem_limit_bytes=vmem_limit,
    )
    cost = pl.CostEstimate(
        flops=4 * n, transcendentals=n, bytes_accessed=2 * total_bytes)

    x_flat = jnp.ravel(x)             # contiguous ravel: free reshape, no copy

    if n % 128 == 0:
        # ---- lane-dense 2-D slab path: no padding, no extra copies ----------
        lanes = 2048
        while lanes > 128 and n % lanes != 0:
            lanes //= 2
        rows_total = n // lanes
        sub_min = {4: 8, 2: 16, 1: 32}.get(itemsize, 8)
        bytes_per_row = lanes * itemsize

        block_rows = max(
            sub_min, (target_block_bytes // bytes_per_row) // sub_min * sub_min)
        if block_rows >= rows_total:
            block_rows = rows_total
            if total_bytes > (2 << 20):
                # Ensure >= 2 grid steps so both v7x TensorCores get work.
                half = pl.cdiv(rows_total, 2)
                block_rows = min(rows_total, pl.cdiv(half, sub_min) * sub_min)
        # Prefer a block_rows that divides rows_total (avoids masked vst.msk
        # boundary block); only search nearby so block size stays near target.
        if 0 < block_rows < rows_total and rows_total % block_rows != 0:
            lo = max(sub_min, block_rows // 2)
            for br in range(block_rows - sub_min, lo - 1, -sub_min):
                if br > 0 and rows_total % br == 0:
                    block_rows = br
                    break

        grid = (pl.cdiv(rows_total, block_rows),)
        x2d = x_flat.reshape(rows_total, lanes)

        out2d = pl.pallas_call(
            _swish_kernel,
            out_shape=jax.ShapeDtypeStruct((rows_total, lanes), orig_dtype),
            grid_spec=pltpu.PrefetchScalarGridSpec(
                num_scalar_prefetch=0,
                grid=grid,
                in_specs=[pl.BlockSpec((block_rows, lanes), lambda i: (i, 0))],
                out_specs=pl.BlockSpec((block_rows, lanes), lambda i: (i, 0)),
            ),
            compiler_params=compiler_params,
            cost_estimate=cost,
        )(x2d)
        return out2d.reshape(orig_shape)

    # ---- ragged path (n % 128 != 0): 1-D blocks, still zero-copy ------------
    max_block_elems = target_block_bytes // itemsize       # multiple of 128
    block_elems = n if n <= max_block_elems else max_block_elems
    grid = (pl.cdiv(n, block_elems),)

    out_flat = pl.pallas_call(
        _swish_kernel,
        out_shape=jax.ShapeDtypeStruct((n,), orig_dtype),
        grid_spec=pltpu.PrefetchScalarGridSpec(
            num_scalar_prefetch=0,
            grid=grid,
            in_specs=[pl.BlockSpec((block_elems,), lambda i: (i,))],
            out_specs=pl.BlockSpec((block_elems,), lambda i: (i,)),
        ),
        compiler_params=compiler_params,
        cost_estimate=cost,
    )(x_flat)
    return out_flat.reshape(orig_shape)


if __name__ == "__main__":
    key = jax.random.PRNGKey(0)

    # NCHW input consistent with how the module would be used.
    x = jax.random.normal(key, (2, 4, 16, 16), dtype=jnp.float32)
    y = swish(x)
    jax.block_until_ready(y)
    y_ref = x * jax.nn.sigmoid(x)
    assert y.shape == x.shape and y.dtype == x.dtype
    assert jnp.allclose(y, y_ref, atol=1e-6, rtol=1e-5)

    # Ragged (n % 128 != 0) path: 1-D full-extent block, no pad/slice copies.
    x2 = jax.random.normal(jax.random.PRNGKey(1), (3, 5, 7), dtype=jnp.float32)
    y2 = swish(x2)
    jax.block_until_ready(y2)
    assert jnp.allclose(y2, x2 * jax.nn.sigmoid(x2), atol=1e-6, rtol=1e-5)

    print("KERNEL_OK")
</pallas_src>

<mosaic_0001>
module attributes {stable_mosaic.version = 11 : i64} {
  func.func @_swish_kernel(%arg0: i32, %arg1: memref<1x2048xf32, #tpu.memory_space<vmem>>, %arg2: memref<1x2048xf32, #tpu.memory_space<vmem>>) attributes {dimension_semantics = [#tpu.dimension_semantics<parallel>], iteration_bounds = array<i64: 1>, scalar_prefetch = 0 : i64, scratch_operands = 0 : i64, tpu.core_type = #tpu.core_type<tc>, window_params = [{transform_indices = @transform_0, window_bounds = array<i64: 1, 2048>}, {transform_indices = @transform_1, window_bounds = array<i64: 1, 2048>}]} {
    %c0 = arith.constant 0 : index
    %c0_0 = arith.constant 0 : index
    %0 = vector.load %arg1[%c0, %c0_0] : memref<1x2048xf32, #tpu.memory_space<vmem>>, vector<1x2048xf32>
    %cst = arith.constant 5.000000e-01 : f32
    %1 = vector.broadcast %cst : f32 to vector<1x2048xf32>
    %2 = arith.mulf %1, %0 : vector<1x2048xf32>
    %3 = math.tanh %2 : vector<1x2048xf32>
    %cst_1 = arith.constant 1.000000e+00 : f32
    %4 = vector.broadcast %cst_1 : f32 to vector<1x2048xf32>
    %5 = arith.addf %3, %4 : vector<1x2048xf32>
    %cst_2 = arith.constant 5.000000e-01 : f32
    %6 = vector.broadcast %cst_2 : f32 to vector<1x2048xf32>
    %7 = arith.mulf %6, %5 : vector<1x2048xf32>
    %8 = arith.mulf %0, %7 : vector<1x2048xf32>
    %c0_3 = arith.constant 0 : index
    %c0_4 = arith.constant 0 : index
    %9 = vector.load %arg2[%c0_3, %c0_4] : memref<1x2048xf32, #tpu.memory_space<vmem>>, vector<1x2048xf32>
    tpu.vector_store %arg2[%c0_3, %c0_4], %8 {strides = array<i32>} : memref<1x2048xf32, #tpu.memory_space<vmem>>, vector<1x2048xf32>,
    return
  }
  func.func @transform_0(%arg0: i32) -> (i32, i32) {
    %c0_i32 = arith.constant 0 : i32
    %c0_i32_0 = arith.constant 0 : i32
    return %arg0, %c0_i32 : i32, i32
  }
  func.func @transform_1(%arg0: i32) -> (i32, i32) {
    %c0_i32 = arith.constant 0 : i32
    %c0_i32_0 = arith.constant 0 : i32
    return %arg0, %c0_i32 : i32, i32
  }
}

</mosaic_0001>

<bundles_post_ra>
// kernel: tpu_custom_call.1
= control target key start
LH: loop header
LB: loop body
LE: loop exit
PB: predicated region body
PF: predicated region fallthrough
CT: control target
= control target key end

     0   :  { %6 = vsyncpa [#allocation3], 0  ;;  %s118_s0 = inlined_call_operand.hbm [shape: f32[1,2048], index: 0, kind: input, shape index: {}]   ;;  %s119_s1 = inlined_call_operand.hbm [shape: f32[1,2048], index: 1, kind: output, shape index: {}]  }
   0x1   :  { %7 = vsyncpa [#allocation4], 0  ;;  %s100_s6 = smov [#allocation2]  }
   0x2   :  { %s14_s7 = sshll.u32 %s100_s6, 4  ;;  %s15_s7 = int_to_ptr.vmem [resolvable:$true] %s14_s7 }
   0x3   :  { %s64_s8 = scalar_lea.vmem %s15_s7, 256  ;;  %p69_p1 = scmp.lt.s32.totalorder %s15_s7, %s15_s7 }
   0x4   :  { %p65_p0 = scmp.ne.s32.totalorder %s15_s7, %s64_s8  ;;  %p70_p2 = scmp.lt.s32.totalorder %s64_s8, %s64_s8 }
   0x6   :  { %p71_p3 = por %p70_p2, %p69_p1 }
   0x8   :  { %p72_p4 = pnand %p71_p3, %p65_p0 }
   0xa   :  { %75 = shalt.err (!%p72_p4)
}
   0xb   :  { %17 = dma.hbm_to_vmem [thread:$0]  %s118_s0, 256, %s15_s7, [#allocation3]  }
   0xc   :  { %96 = dma.done.wait [#allocation3], 256  }
   0xd   :  { %97 = vsyncadd [#allocation3], 4294967040  ;;  %v21_v0 = vld [vmem:[#allocation2] sm:$0xff]  ;;  %v22_v1 = vld [vmem:[#allocation2 + $0x8] sm:$0xff]  ;;  %s101_s11 = smov [#allocation5]  }
   0xe   :  { %v23_v2 = vmul.f32 0.5, %v21_v0  ;;  %v24_v3 = vmul.f32 0.5, %v22_v1  ;;  %s41_s12 = sshll.u32 %s101_s11, 4  ;;  %s42_s12 = int_to_ptr.vmem [resolvable:$true] %s41_s12 }
   0xf   :  { %s76_s0 = scalar_lea.vmem %s42_s12, 256  ;;  %p81_p6 = scmp.lt.s32.totalorder %s42_s12, %s42_s12 }
  0x10   :  { %52 = vtanh.f32 %v23_v2  ;;  %p77_p5 = scmp.ne.s32.totalorder %s42_s12, %s76_s0  ;;  %p82_p7 = scmp.lt.s32.totalorder %s76_s0, %s76_s0 }
  0x11   :  { %54 = vtanh.f32 %v24_v3 }
  0x12   :  { %p83_p8 = por %p82_p7, %p81_p6 }
  0x14   :  { %p84_p9 = pnand %p83_p8, %p77_p5 }
  0x1d   :  { %v53_v4 = vpop.eup %52 }
  0x1e   :  { %v55_v5 = vpop.eup %54  ;;  %v27_v6 = vadd.f32 1.0, %v53_v4 }
  0x1f   :  { %v28_v7 = vadd.f32 1.0, %v55_v5 }
  0x20   :  { %v29_v8 = vmul.f32 0.5, %v27_v6 }
  0x21   :  { %v30_v9 = vmul.f32 0.5, %v28_v7 }
  0x22   :  { %v31_v10 = vmul.f32 %v29_v8, %v21_v0 }
  0x23   :  { %v32_v11 = vmul.f32 %v30_v9, %v22_v1 }
  0x24   :  { %33 = vst [vmem:[#allocation5] sm:$0xff] %v31_v10 }
  0x25   :  { %34 = vst [vmem:[#allocation5 + $0x8] sm:$0xff] %v32_v11 }
  0x26   :  { %87 = shalt.err (!%p84_p9)
}
  0x27   :  { %44 = dma.vmem_to_hbm [thread:$0]  %s42_s12, 256, %s119_s1, [#allocation4]  }
  0x28   :  { %98 = dma.done.wait [#allocation4], 256  }
  0x29   :  { %99 = vsyncadd [#allocation4], 4294967040 }
  0x2a   :  { %48 = vsyncpa [#allocation3], 1 }
  0x2b   :  { %49 = vsyncpa [#allocation4], 1 }

</bundles_post_ra>
